<compile_context>
chip_gen: v5e
topology: v5e:2x2
jax: 0.10.0
libtpu: 0.0.40
codegen_flags: <defaults>
</compile_context>

<pallas_src>
import functools

import jax
import jax.numpy as jnp
from jax.experimental import pallas as pl
from jax.experimental.pallas import tpu as pltpu


# --------------------------------------------------------------------------- #
# Hardware-aware budgets / tiling                                              #
# --------------------------------------------------------------------------- #

def _vmem_limit_bytes() -> int:
    """Generation-aware scoped-VMEM limit (v5e/v6e: 128 MiB phys, v7x: 64 MiB)."""
    cap = 64 * 1024 * 1024
    try:
        cap = int(pltpu.get_tpu_info().vmem_capacity_bytes)
    except Exception:
        pass
    # ~75% of physical, with headroom for Mosaic-internal scratch / semaphores.
    return max(32 * 1024 * 1024, min((cap * 3) // 4, 100 * 1024 * 1024))


def _row_quantum(dtype) -> int:
    """Sublane packing quantum per dtype width (f32:8, bf16:16, int8/fp8:32)."""
    return {4: 8, 2: 16, 1: 32}.get(jnp.dtype(dtype).itemsize, 8)


def _choose_tile_rows(n_rows: int, d_lanes: int, dtype, vmem_limit: int) -> int:
    """Rows per batch tile for the two-pass path: multi-MiB blocks, dtype-aware."""
    q = _row_quantum(dtype)
    itemsize = jnp.dtype(dtype).itemsize
    rows_target = (8 * 1024 * 1024) // max(1, itemsize * d_lanes)       # ~8 MiB HBM block
    rows_vmem = vmem_limit // max(1, 32 * d_lanes)                       # ~8 f32 copies fit
    rows = max(q, min(rows_target, rows_vmem))
    if rows >= n_rows:
        return n_rows                      # single block; full-dim block is always legal
    return max(q, (rows // q) * q)


def _fold_matrix(k: int, d: int):
    """(k*d, k*d) matrix F with F[i,j] = 1 iff i%d == j%d.

    For a lane-dense row layout (k groups of d features per 128-lane row),
    v @ F sums the k per-group partials of each feature AND broadcasts the
    result back to every group — fold + unfold in one tiny MXU matmul.
    (d divides 128 here, hence d is a power of two and `& (d-1)` == `% d`.)
    """
    dk = k * d
    ii = jax.lax.broadcasted_iota(jnp.int32, (dk, dk), 0)
    jj = jax.lax.broadcasted_iota(jnp.int32, (dk, dk), 1)
    return ((ii & (d - 1)) == (jj & (d - 1))).astype(jnp.float32)


# --------------------------------------------------------------------------- #
# Kernels                                                                      #
# --------------------------------------------------------------------------- #

def _make_fused_kernel(np_rows: int, k: int, d_feat: int,
                       epsilon: float, unnorm: bool, norm_only: bool):
    """x fully resident in VMEM: stats + running update + normalize, one pass."""
    n_total = np_rows * k                     # original batch count
    var_denom = float(max(n_total - 1, 1))    # unbiased; clamp so N==1 doesn't NaN
    bc = float(n_total)
    inv_n = 1.0 / float(n_total)

    def kernel(x_ref, rmean_ref, rvar_ref, count_ref,
               y_ref, new_mean_ref, new_var_ref):
        x = x_ref[...].astype(jnp.float32)                      # (np_rows, k*d)
        fold = _fold_matrix(k, d_feat) if k > 1 else None

        s1 = jnp.sum(x, axis=0, keepdims=True)                  # per-column sums
        if k > 1:
            s1 = jnp.dot(s1, fold, preferred_element_type=jnp.float32)
        mean_b = s1 * inv_n                                     # tiled batch mean
        diff = x - mean_b
        m2 = jnp.sum(diff * diff, axis=0, keepdims=True)
        if k > 1:
            m2 = jnp.dot(m2, fold, preferred_element_type=jnp.float32)
        batch_var = m2 * (1.0 / var_denom)

        # _update_mean_var_count_from_moments (tiled layout)
        mean = rmean_ref[...]
        var = rvar_ref[...]
        count = count_ref[0]
        delta = mean_b - mean
        tot = count + bc
        new_mean = mean + delta * (bc / tot)
        m2r = var * count + batch_var * bc + (delta * delta) * (count * bc / tot)
        new_var = m2r / tot
        new_mean_ref[...] = new_mean
        new_var_ref[...] = new_var

        # normalize with the POST-update running stats (torch semantics)
        if unnorm:
            y = jnp.clip(x, -5.0, 5.0) * jnp.sqrt(new_var + epsilon) + new_mean
        elif norm_only:
            y = x * jax.lax.rsqrt(new_var + epsilon)
        else:
            y = jnp.clip((x - new_mean) * jax.lax.rsqrt(new_var + epsilon), -5.0, 5.0)
        y_ref[...] = y.astype(y_ref.dtype)

    return kernel


def _make_stats_kernel(np_rows: int, tile_rows: int, k: int, d_feat: int):
    """Two-pass fallback, pass 1: per-column Chan/Welford over row tiles, then
    group-fold (if lane-dense) + running-moment update at finalize."""
    nt = pl.cdiv(np_rows, tile_rows)
    ragged = (np_rows % tile_rows) != 0
    last_valid = np_rows - (nt - 1) * tile_rows            # static
    n_total = np_rows * k
    var_denom = float(max(n_total - 1, 1))
    bc = float(n_total)

    def kernel(x_ref, rmean_ref, rvar_ref, count_ref,
               new_mean_ref, new_var_ref, mean_acc, m2_acc):
        i = pl.program_id(0)

        @pl.when(i == 0)
        def _init():
            mean_acc[...] = jnp.zeros_like(mean_acc)
            m2_acc[...] = jnp.zeros_like(m2_acc)

        def combine(tile_mean, tile_m2, n_j, n_prev):
            n_new = n_prev + n_j
            delta = tile_mean - mean_acc[...]
            mean_acc[...] = mean_acc[...] + delta * (n_j / n_new)
            m2_acc[...] = m2_acc[...] + tile_m2 + (delta * delta) * (n_prev * n_j / n_new)

        def full_tile():
            x = x_ref[...].astype(jnp.float32)
            tile_mean = jnp.sum(x, axis=0, keepdims=True) * (1.0 / tile_rows)
            diff = x - tile_mean
            tile_m2 = jnp.sum(diff * diff, axis=0, keepdims=True)
            combine(tile_mean, tile_m2, jnp.float32(tile_rows),
                    (i * tile_rows).astype(jnp.float32))

        if ragged:
            # Full tiles run the cheap unmasked path; only the last tile pays
            # the mask (built from a (rows, 1) sublane iota, broadcast by where).
            @pl.when(i < nt - 1)
            def _full():
                full_tile()

            @pl.when(i == nt - 1)
            def _last():
                x = x_ref[...].astype(jnp.float32)
                rows = jax.lax.broadcasted_iota(jnp.int32, (tile_rows, 1), 0)
                valid = rows < last_valid
                xz = jnp.where(valid, x, 0.0)
                tile_mean = jnp.sum(xz, axis=0, keepdims=True) * (1.0 / last_valid)
                diff = jnp.where(valid, x - tile_mean, 0.0)
                tile_m2 = jnp.sum(diff * diff, axis=0, keepdims=True)
                combine(tile_mean, tile_m2, jnp.float32(last_valid),
                        jnp.float32((nt - 1) * tile_rows))
        else:
            full_tile()

        @pl.when(i == nt - 1)
        def _finalize():
            m_c = mean_acc[...]          # per-column mean over np_rows samples
            m2_c = m2_acc[...]           # per-column M2  over np_rows samples
            if k > 1:
                fold = _fold_matrix(k, d_feat)
                sm = jnp.dot(m_c, fold, preferred_element_type=jnp.float32)
                mean_b = sm * (1.0 / k)
                sm2 = jnp.dot(m_c * m_c, fold, preferred_element_type=jnp.float32)
                sM2 = jnp.dot(m2_c, fold, preferred_element_type=jnp.float32)
                # Chan combine of the k equal-sized groups of each feature.
                m2_b = sM2 + float(np_rows) * (sm2 - float(k) * mean_b * mean_b)
            else:
                mean_b = m_c
                m2_b = m2_c
            batch_var = m2_b * (1.0 / var_denom)

            mean = rmean_ref[...]
            var = rvar_ref[...]
            count = count_ref[0]
            delta = mean_b - mean
            tot = count + bc
            new_mean_ref[...] = mean + delta * (bc / tot)
            m2r = var * count + batch_var * bc + (delta * delta) * (count * bc / tot)
            new_var_ref[...] = m2r / tot

    return kernel, nt


def _make_norm_kernel(epsilon: float, unnorm: bool, norm_only: bool):
    """Two-pass fallback, pass 2 / eval path: streaming normalize + clamp.
    NOTE: ragged last block relies on Pallas dropping OOB output rows — every op
    here must stay elementwise (no cross-row reductions)."""
    def kernel(x_ref, mean_ref, var_ref, y_ref):
        x = x_ref[...].astype(jnp.float32)
        mean = mean_ref[...]
        var = var_ref[...]
        if unnorm:
            y = jnp.clip(x, -5.0, 5.0) * jnp.sqrt(var + epsilon) + mean
        elif norm_only:
            y = x * jax.lax.rsqrt(var + epsilon)
        else:
            y = jnp.clip((x - mean) * jax.lax.rsqrt(var + epsilon), -5.0, 5.0)
        y_ref[...] = y.astype(y_ref.dtype)
    return kernel


# --------------------------------------------------------------------------- #
# Wrapper                                                                      #
# --------------------------------------------------------------------------- #

@functools.partial(jax.jit,
                   static_argnames=("training", "unnorm", "norm_only", "epsilon",
                                    "tile_n", "lane_densify", "force_two_pass"))
def running_mean_std_forward(x, running_mean, running_var, count, *,
                             training=True, unnorm=False, norm_only=False,
                             epsilon=1e-5, tile_n=None, lane_densify=True,
                             force_two_pass=False):
    """Pallas-backed forward.  Returns (y, new_mean, new_var, new_count)."""
    n, d = x.shape
    vmem_limit = _vmem_limit_bytes()

    # Lane densification: (N, D) -> (N/k, k*D) with k*D == 128 (free reshape).
    k = 1
    if lane_densify and d < 128 and (128 % d == 0) and (n % (128 // d) == 0):
        k = 128 // d
    np_rows = n // k
    dk = d * k
    xd = x.reshape(np_rows, dk) if k > 1 else x

    rm = running_mean.reshape(1, d).astype(jnp.float32)
    rv = running_var.reshape(1, d).astype(jnp.float32)
    rm_t = jnp.tile(rm, (1, k)) if k > 1 else rm
    rv_t = jnp.tile(rv, (1, k)) if k > 1 else rv
    cnt = count.reshape(1).astype(jnp.float32)

    itemsize = x.dtype.itemsize
    x_bytes = n * d * itemsize
    x_f32_bytes = n * d * 4
    # rough working set of the fused kernel: in/out blocks + f32 temporaries
    fused_ws = 4 * x_bytes + 4 * x_f32_bytes
    use_fused = training and (not force_two_pass) and fused_ws <= int(vmem_limit * 0.8)

    # ---------------- fused single-pass path (x resident in VMEM) ----------- #
    if use_fused:
        kern = _make_fused_kernel(np_rows, k, d, float(epsilon), unnorm, norm_only)
        y_d, new_mean_t, new_var_t = pl.pallas_call(
            kern,
            out_shape=(jax.ShapeDtypeStruct((np_rows, dk), x.dtype),
                       jax.ShapeDtypeStruct((1, dk), jnp.float32),
                       jax.ShapeDtypeStruct((1, dk), jnp.float32)),
            grid=(1,),
            in_specs=[
                pl.BlockSpec((np_rows, dk), lambda i: (0, 0)),
                pl.BlockSpec((1, dk), lambda i: (0, 0)),
                pl.BlockSpec((1, dk), lambda i: (0, 0)),
                pl.BlockSpec(memory_space=pltpu.MemorySpace.SMEM),
            ],
            out_specs=(pl.BlockSpec((np_rows, dk), lambda i: (0, 0)),
                       pl.BlockSpec((1, dk), lambda i: (0, 0)),
                       pl.BlockSpec((1, dk), lambda i: (0, 0))),
            compiler_params=pltpu.CompilerParams(
                dimension_semantics=("arbitrary",),
                vmem_limit_bytes=vmem_limit),
            cost_estimate=pl.CostEstimate(
                flops=int(10 * n * d), transcendentals=int(dk),
                bytes_accessed=int(2 * x_bytes)),
        )(xd, rm_t, rv_t, cnt)
        y = y_d.reshape(n, d) if k > 1 else y_d
        new_mean = new_mean_t[0, :d]
        new_var = new_var_t[0, :d]
        new_count = (cnt[0] + float(n)).reshape(())
        return y, new_mean, new_var, new_count

    # ---------------- two-pass fallback (large x) ---------------------------- #
    if tile_n is not None:
        tr = min(int(tile_n), np_rows)
        if tr < np_rows:
            q = _row_quantum(x.dtype)
            tr = max(q, (tr // q) * q)
            tr = min(tr, np_rows)
    else:
        tr = _choose_tile_rows(np_rows, dk, x.dtype, vmem_limit)

    if training:
        stats_kernel, nt = _make_stats_kernel(np_rows, tr, k, d)
        new_mean_t, new_var_t = pl.pallas_call(
            stats_kernel,
            out_shape=(jax.ShapeDtypeStruct((1, dk), jnp.float32),
                       jax.ShapeDtypeStruct((1, dk), jnp.float32)),
            grid=(nt,),
            in_specs=[
                pl.BlockSpec((tr, dk), lambda i: (i, 0)),
                pl.BlockSpec((1, dk), lambda i: (0, 0)),
                pl.BlockSpec((1, dk), lambda i: (0, 0)),
                pl.BlockSpec(memory_space=pltpu.MemorySpace.SMEM),
            ],
            out_specs=(pl.BlockSpec((1, dk), lambda i: (0, 0)),
                       pl.BlockSpec((1, dk), lambda i: (0, 0))),
            scratch_shapes=[pltpu.VMEM((1, dk), jnp.float32),
                            pltpu.VMEM((1, dk), jnp.float32)],
            compiler_params=pltpu.CompilerParams(
                dimension_semantics=("arbitrary",),
                vmem_limit_bytes=vmem_limit),
            cost_estimate=pl.CostEstimate(
                flops=int(6 * n * d), transcendentals=0,
                bytes_accessed=int(x_bytes + 6 * dk * 4)),
        )(xd, rm_t, rv_t, cnt)
        cur_mean_t, cur_var_t = new_mean_t, new_var_t
        new_mean = new_mean_t[0, :d]
        new_var = new_var_t[0, :d]
        new_count = (cnt[0] + float(n)).reshape(())
    else:
        cur_mean_t, cur_var_t = rm_t, rv_t
        new_mean = rm[0, :]
        new_var = rv[0, :]
        new_count = cnt[0].reshape(())

    nt_norm = pl.cdiv(np_rows, tr)
    norm_kernel = _make_norm_kernel(float(epsilon), unnorm, norm_only)
    y_d = pl.pallas_call(
        norm_kernel,
        out_shape=jax.ShapeDtypeStruct((np_rows, dk), x.dtype),
        grid=(nt_norm,),
        in_specs=[
            pl.BlockSpec((tr, dk), lambda i: (i, 0)),
            pl.BlockSpec((1, dk), lambda i: (0, 0)),
            pl.BlockSpec((1, dk), lambda i: (0, 0)),
        ],
        out_specs=pl.BlockSpec((tr, dk), lambda i: (i, 0)),
        compiler_params=pltpu.CompilerParams(
            dimension_semantics=("parallel",),
            vmem_limit_bytes=vmem_limit),
        cost_estimate=pl.CostEstimate(
            flops=int(4 * n * d), transcendentals=int(nt_norm * dk),
            bytes_accessed=int(2 * x_bytes + 2 * dk * 4)),
    )(xd, cur_mean_t, cur_var_t)
    y = y_d.reshape(n, d) if k > 1 else y_d

    return y, new_mean.reshape(d), new_var.reshape(d), new_count


class RunningMeanStd:
    """JAX/Pallas port of the PyTorch RunningMeanStd (per_channel=False path)."""

    def __init__(self, insize, epsilon=1e-5, norm_only=False):
        self.insize = int(insize)
        self.epsilon = float(epsilon)
        self.norm_only = norm_only
        self.training = True
        self.running_mean = jnp.zeros((self.insize,), jnp.float32)
        self.running_var = jnp.ones((self.insize,), jnp.float32)
        self.count = jnp.ones((), jnp.float32)

    def __call__(self, x, unnorm=False, eval_only=False):
        train = self.training and (not eval_only)
        y, new_mean, new_var, new_count = running_mean_std_forward(
            x, self.running_mean, self.running_var, self.count,
            training=train, unnorm=unnorm, norm_only=self.norm_only,
            epsilon=self.epsilon)
        if train:
            self.running_mean = new_mean
            self.running_var = new_var
            self.count = new_count
        return y


# --------------------------------------------------------------------------- #
# Pure-JAX reference + self-test                                               #
# --------------------------------------------------------------------------- #

def _reference(x, rmean, rvar, count, epsilon, training=True,
               unnorm=False, norm_only=False):
    x = x.astype(jnp.float32)
    if training:
        n = x.shape[0]
        bm = jnp.mean(x, axis=0)
        bv = jnp.sum((x - bm) ** 2, axis=0) / max(n - 1, 1)
        delta = bm - rmean
        tot = count + n
        new_mean = rmean + delta * n / tot
        m2 = rvar * count + bv * n + delta ** 2 * count * n / tot
        new_var = m2 / tot
        new_count = tot
    else:
        new_mean, new_var, new_count = rmean, rvar, count
    if unnorm:
        y = jnp.sqrt(new_var + epsilon) * jnp.clip(x, -5.0, 5.0) + new_mean
    elif norm_only:
        y = x / jnp.sqrt(new_var + epsilon)
    else:
        y = jnp.clip((x - new_mean) / jnp.sqrt(new_var + epsilon), -5.0, 5.0)
    return y, new_mean, new_var, new_count


if __name__ == "__main__":
    key = jax.random.PRNGKey(0)
    N, D = 8, 32                      # batch=8, hidden=32
    x = jax.random.normal(key, (N, D), dtype=jnp.float32) * 3.0 + 1.5

    rms = RunningMeanStd(D, epsilon=1e-5)

    # training forward (fused, lane-dense path): updates stats, normalizes + clamps
    y = rms(x)
    jax.block_until_ready(y)

    y_ref, m_ref, v_ref, c_ref = _reference(
        x, jnp.zeros((D,), jnp.float32), jnp.ones((D,), jnp.float32),
        jnp.ones((), jnp.float32), 1e-5)
    assert jnp.allclose(y, y_ref, atol=1e-5, rtol=1e-5)
    assert jnp.allclose(rms.running_mean, m_ref, atol=1e-5, rtol=1e-5)
    assert jnp.allclose(rms.running_var, v_ref, atol=1e-5, rtol=1e-5)
    assert jnp.allclose(rms.count, c_ref)

    # eval-only forward (single streaming normalize pass)
    rms.training = False
    y_eval = rms(x, eval_only=True)
    jax.block_until_ready(y_eval)
    y_eval_ref, *_ = _reference(x, m_ref, v_ref, c_ref, 1e-5, training=False)
    assert jnp.allclose(y_eval, y_eval_ref, atol=1e-5, rtol=1e-5)

    # unnorm path
    y_un = rms(x, unnorm=True, eval_only=True)
    jax.block_until_ready(y_un)
    y_un_ref, *_ = _reference(x, m_ref, v_ref, c_ref, 1e-5,
                              training=False, unnorm=True)
    assert jnp.allclose(y_un, y_un_ref, atol=1e-5, rtol=1e-5)

    # two-pass fallback, non lane-dense, multi-tile + ragged last tile
    x2 = jax.random.normal(jax.random.PRNGKey(1), (40, D), jnp.float32) * 2.0 - 0.7
    y2, m2_, v2_, c2_ = running_mean_std_forward(
        x2, jnp.zeros((D,), jnp.float32), jnp.ones((D,), jnp.float32),
        jnp.ones((), jnp.float32), training=True, epsilon=1e-5,
        tile_n=16, lane_densify=False, force_two_pass=True)
    jax.block_until_ready(y2)
    y2_ref, m2_ref, v2_ref, c2_ref = _reference(
        x2, jnp.zeros((D,), jnp.float32), jnp.ones((D,), jnp.float32),
        jnp.ones((), jnp.float32), 1e-5)
    assert jnp.allclose(y2, y2_ref, atol=1e-4, rtol=1e-4)
    assert jnp.allclose(m2_, m2_ref, atol=1e-4, rtol=1e-4)
    assert jnp.allclose(v2_, v2_ref, atol=1e-4, rtol=1e-4)
    assert jnp.allclose(c2_, c2_ref)

    # two-pass fallback, lane-dense, multi-tile + ragged (exercises group fold)
    x3 = jax.random.normal(jax.random.PRNGKey(2), (336, D), jnp.float32) * 1.3 + 0.4
    y3, m3_, v3_, c3_ = running_mean_std_forward(
        x3, jnp.zeros((D,), jnp.float32), jnp.ones((D,), jnp.float32),
        jnp.ones((), jnp.float32), training=True, epsilon=1e-5,
        tile_n=32, force_two_pass=True)
    jax.block_until_ready(y3)
    y3_ref, m3_ref, v3_ref, c3_ref = _reference(
        x3, jnp.zeros((D,), jnp.float32), jnp.ones((D,), jnp.float32),
        jnp.ones((), jnp.float32), 1e-5)
    assert jnp.allclose(y3, y3_ref, atol=1e-4, rtol=1e-4)
    assert jnp.allclose(m3_, m3_ref, atol=1e-4, rtol=1e-4)
    assert jnp.allclose(v3_, v3_ref, atol=1e-4, rtol=1e-4)
    assert jnp.allclose(c3_, c3_ref)

    print("KERNEL_OK")
</pallas_src>

<mosaic_0001>
module attributes {stable_mosaic.version = 11 : i64} {
  func.func @kernel(%arg0: i32, %arg1: memref<2x128xf32, #tpu.memory_space<vmem>>, %arg2: memref<1x128xf32, #tpu.memory_space<vmem>>, %arg3: memref<1x128xf32, #tpu.memory_space<vmem>>, %arg4: memref<1xf32, #tpu.memory_space<smem>>, %arg5: memref<2x128xf32, #tpu.memory_space<vmem>>, %arg6: memref<1x128xf32, #tpu.memory_space<vmem>>, %arg7: memref<1x128xf32, #tpu.memory_space<vmem>>) attributes {dimension_semantics = [#tpu.dimension_semantics<arbitrary>], iteration_bounds = array<i64: 1>, scalar_prefetch = 0 : i64, scratch_operands = 0 : i64, tpu.core_type = #tpu.core_type<tc>, window_params = [{pipeline_mode = #tpu.pipeline_mode<synchronous>, transform_indices = @transform_0, window_bounds = array<i64: 2, 128>}, {pipeline_mode = #tpu.pipeline_mode<synchronous>, transform_indices = @transform_1, window_bounds = array<i64: 1, 128>}, {pipeline_mode = #tpu.pipeline_mode<synchronous>, transform_indices = @transform_2, window_bounds = array<i64: 1, 128>}, {transform_indices = @transform_3, window_bounds = array<i64: 1>}, {pipeline_mode = #tpu.pipeline_mode<synchronous>, transform_indices = @transform_4, window_bounds = array<i64: 2, 128>}, {pipeline_mode = #tpu.pipeline_mode<synchronous>, transform_indices = @transform_5, window_bounds = array<i64: 1, 128>}, {pipeline_mode = #tpu.pipeline_mode<synchronous>, transform_indices = @transform_6, window_bounds = array<i64: 1, 128>}]} {
    %c0 = arith.constant 0 : index
    %c0_0 = arith.constant 0 : index
    %0 = vector.load %arg1[%c0, %c0_0] : memref<2x128xf32, #tpu.memory_space<vmem>>, vector<2x128xf32>
    %1 = tpu.iota {dimensions = array<i32: 0>} : vector<128x128xi32>
    %2 = tpu.iota {dimensions = array<i32: 1>} : vector<128x128xi32>
    %c31_i32 = arith.constant 31 : i32
    %3 = vector.broadcast %c31_i32 : i32 to vector<128x128xi32>
    %4 = arith.andi %1, %3 : vector<128x128xi32>
    %c31_i32_1 = arith.constant 31 : i32
    %5 = vector.broadcast %c31_i32_1 : i32 to vector<128x128xi32>
    %6 = arith.andi %2, %5 : vector<128x128xi32>
    %7 = arith.cmpi eq, %4, %6 : vector<128x128xi32>
    %8 = arith.extui %7 : vector<128x128xi1> to vector<128x128xi32>
    %9 = arith.sitofp %8 : vector<128x128xi32> to vector<128x128xf32>
    %cst = arith.constant dense<0.000000e+00> : vector<128xf32>
    %10 = vector.multi_reduction <add>, %0, %cst [0] : vector<2x128xf32> to vector<128xf32>
    %11 = vector.shape_cast %10 : vector<128xf32> to vector<1x128xf32>
    %cst_2 = arith.constant dense<0.000000e+00> : vector<1x128xf32>
    %12 = tpu.matmul %11, %9, %cst_2 {dimension_numbers = #tpu.dot_dimension_numbers<[1], [0], [0], [1], [0, 0, 1, 1], [], []>} : vector<1x128xf32>, vector<128x128xf32>, vector<1x128xf32> -> vector<1x128xf32>
    %cst_3 = arith.constant 1.250000e-01 : f32
    %13 = vector.broadcast %cst_3 : f32 to vector<1x128xf32>
    %14 = arith.mulf %12, %13 : vector<1x128xf32>
    %15 = vector.broadcast %14 : vector<1x128xf32> to vector<2x128xf32>
    %16 = arith.subf %0, %15 : vector<2x128xf32>
    %17 = arith.mulf %16, %16 : vector<2x128xf32>
    %cst_4 = arith.constant dense<0.000000e+00> : vector<128xf32>
    %18 = vector.multi_reduction <add>, %17, %cst_4 [0] : vector<2x128xf32> to vector<128xf32>
    %19 = vector.shape_cast %18 : vector<128xf32> to vector<1x128xf32>
    %cst_5 = arith.constant dense<0.000000e+00> : vector<1x128xf32>
    %20 = tpu.matmul %19, %9, %cst_5 {dimension_numbers = #tpu.dot_dimension_numbers<[1], [0], [0], [1], [0, 0, 1, 1], [], []>} : vector<1x128xf32>, vector<128x128xf32>, vector<1x128xf32> -> vector<1x128xf32>
    %cst_6 = arith.constant 0.142857149 : f32
    %21 = vector.broadcast %cst_6 : f32 to vector<1x128xf32>
    %22 = arith.mulf %20, %21 : vector<1x128xf32>
    %c0_7 = arith.constant 0 : index
    %c0_8 = arith.constant 0 : index
    %23 = vector.load %arg2[%c0_7, %c0_8] : memref<1x128xf32, #tpu.memory_space<vmem>>, vector<1x128xf32>
    %c0_9 = arith.constant 0 : index
    %c0_10 = arith.constant 0 : index
    %24 = vector.load %arg3[%c0_9, %c0_10] : memref<1x128xf32, #tpu.memory_space<vmem>>, vector<1x128xf32>
    %c0_11 = arith.constant 0 : index
    %25 = memref.load %arg4[%c0_11] : memref<1xf32, #tpu.memory_space<smem>>
    %26 = arith.subf %14, %23 : vector<1x128xf32>
    %cst_12 = arith.constant 8.000000e+00 : f32
    %27 = arith.addf %25, %cst_12 : f32
    %cst_13 = arith.constant 8.000000e+00 : f32
    %28 = arith.divf %cst_13, %27 : f32
    %29 = vector.broadcast %28 : f32 to vector<1x128xf32>
    %30 = arith.mulf %26, %29 : vector<1x128xf32>
    %31 = arith.addf %23, %30 : vector<1x128xf32>
    %32 = vector.broadcast %25 : f32 to vector<1x128xf32>
    %33 = arith.mulf %24, %32 : vector<1x128xf32>
    %cst_14 = arith.constant 8.000000e+00 : f32
    %34 = vector.broadcast %cst_14 : f32 to vector<1x128xf32>
    %35 = arith.mulf %22, %34 : vector<1x128xf32>
    %36 = arith.addf %33, %35 : vector<1x128xf32>
    %37 = arith.mulf %26, %26 : vector<1x128xf32>
    %cst_15 = arith.constant 8.000000e+00 : f32
    %38 = arith.mulf %25, %cst_15 : f32
    %39 = arith.divf %38, %27 : f32
    %40 = vector.broadcast %39 : f32 to vector<1x128xf32>
    %41 = arith.mulf %37, %40 : vector<1x128xf32>
    %42 = arith.addf %36, %41 : vector<1x128xf32>
    %43 = vector.broadcast %27 : f32 to vector<1x128xf32>
    %44 = arith.divf %42, %43 : vector<1x128xf32>
    %c0_16 = arith.constant 0 : index
    %c0_17 = arith.constant 0 : index
    %45 = vector.load %arg6[%c0_16, %c0_17] : memref<1x128xf32, #tpu.memory_space<vmem>>, vector<1x128xf32>
    tpu.vector_store %arg6[%c0_16, %c0_17], %31 {strides = array<i32>} : memref<1x128xf32, #tpu.memory_space<vmem>>, vector<1x128xf32>,
    %c0_18 = arith.constant 0 : index
    %c0_19 = arith.constant 0 : index
    %46 = vector.load %arg7[%c0_18, %c0_19] : memref<1x128xf32, #tpu.memory_space<vmem>>, vector<1x128xf32>
    tpu.vector_store %arg7[%c0_18, %c0_19], %44 {strides = array<i32>} : memref<1x128xf32, #tpu.memory_space<vmem>>, vector<1x128xf32>,
    %47 = vector.broadcast %31 : vector<1x128xf32> to vector<2x128xf32>
    %48 = arith.subf %0, %47 : vector<2x128xf32>
    %cst_20 = arith.constant 9.99999974E-6 : f32
    %49 = vector.broadcast %cst_20 : f32 to vector<1x128xf32>
    %50 = arith.addf %44, %49 : vector<1x128xf32>
    %51 = math.rsqrt %50 : vector<1x128xf32>
    %52 = vector.broadcast %51 : vector<1x128xf32> to vector<2x128xf32>
    %53 = arith.mulf %48, %52 : vector<2x128xf32>
    %cst_21 = arith.constant -5.000000e+00 : f32
    %cst_22 = arith.constant 5.000000e+00 : f32
    %54 = vector.broadcast %cst_21 : f32 to vector<2x128xf32>
    %55 = arith.maximumf %54, %53 : vector<2x128xf32>
    %56 = vector.broadcast %cst_22 : f32 to vector<2x128xf32>
    %57 = arith.minimumf %56, %55 : vector<2x128xf32>
    %c0_23 = arith.constant 0 : index
    %c0_24 = arith.constant 0 : index
    %58 = vector.load %arg5[%c0_23, %c0_24] : memref<2x128xf32, #tpu.memory_space<vmem>>, vector<2x128xf32>
    tpu.vector_store %arg5[%c0_23, %c0_24], %57 {strides = array<i32>} : memref<2x128xf32, #tpu.memory_space<vmem>>, vector<2x128xf32>,
    return
  }
  func.func @transform_0(%arg0: i32) -> (i32, i32) {
    %c0_i32 = arith.constant 0 : i32
    %c0_i32_0 = arith.constant 0 : i32
    %c0_i32_1 = arith.constant 0 : i32
    return %c0_i32, %c0_i32_0 : i32, i32
  }
  func.func @transform_1(%arg0: i32) -> (i32, i32) {
    %c0_i32 = arith.constant 0 : i32
    %c0_i32_0 = arith.constant 0 : i32
    %c0_i32_1 = arith.constant 0 : i32
    return %c0_i32, %c0_i32_0 : i32, i32
  }
  func.func @transform_2(%arg0: i32) -> (i32, i32) {
    %c0_i32 = arith.constant 0 : i32
    %c0_i32_0 = arith.constant 0 : i32
    %c0_i32_1 = arith.constant 0 : i32
    return %c0_i32, %c0_i32_0 : i32, i32
  }
  func.func @transform_3(%arg0: i32) -> i32 {
    %c0_i32 = arith.constant 0 : i32
    %c0_i32_0 = arith.constant 0 : i32
    return %c0_i32 : i32
  }
  func.func @transform_4(%arg0: i32) -> (i32, i32) {
    %c0_i32 = arith.constant 0 : i32
    %c0_i32_0 = arith.constant 0 : i32
    %c0_i32_1 = arith.constant 0 : i32
    return %c0_i32, %c0_i32_0 : i32, i32
  }
  func.func @transform_5(%arg0: i32) -> (i32, i32) {
    %c0_i32 = arith.constant 0 : i32
    %c0_i32_0 = arith.constant 0 : i32
    %c0_i32_1 = arith.constant 0 : i32
    return %c0_i32, %c0_i32_0 : i32, i32
  }
  func.func @transform_6(%arg0: i32) -> (i32, i32) {
    %c0_i32 = arith.constant 0 : i32
    %c0_i32_0 = arith.constant 0 : i32
    %c0_i32_1 = arith.constant 0 : i32
    return %c0_i32, %c0_i32_0 : i32, i32
  }
}

</mosaic_0001>

<bundles_post_ra>
// kernel: running_mean_std_forward.1
= control target key start
LH: loop header
LB: loop body
LE: loop exit
PB: predicated region body
PF: predicated region fallthrough
CT: control target
= control target key end

     0   :  { %v22_v0 = vlaneseq  ;;  %v325_v15 = vmov 1.0   ;;  %vm106_vm2 = vcmask 1041408   ;;  %s535_s0 = inlined_call_operand.vmem [shape: f32[2,128], index: 0, kind: input, shape index: {}]   ;;  %s536_s3 = inlined_call_operand.<no memory space> [shape: f32[1], index: 3, kind: input, shape index: {}]   ;;  %s537_s1 = inlined_call_operand.vmem [shape: f32[1,128], index: 1, kind: input, shape index: {}]   ;;  %s538_s5 = inlined_call_operand.vmem [shape: f32[1,128], index: 5, kind: output, shape index: {1}]   ;;  %s539_s2 = inlined_call_operand.vmem [shape: f32[1,128], index: 2, kind: input, shape index: {}]   ;;  %s540_s6 = inlined_call_operand.vmem [shape: f32[1,128], index: 6, kind: output, shape index: {2}]   ;;  %s541_s4 = inlined_call_operand.vmem [shape: f32[2,128], index: 4, kind: output, shape index: {0}]  }
   0x1   :  { %v381_v16 = vld [vmem:[%s535_s0] sm:$0x3]  ;;  %s170_s24 = sadd.f32 8.0, %s536_s3  ;;  %s196_s28 = smul.f32 8.0, %s536_s3 }
   0x2   :  { %v361_v1 = vshrl.u32 %v22_v0, 7  ;;  %v40_v2 = vand.u32 127, %v22_v0  ;;  %v107_v22 = vsel %vm106_vm2, %v381_v16, 0.0 }
   0x3   :  { %v108_v26 = vrot.slane %v107_v22, 4  ;;  %v171_v30 = vstv %s170_s24 }
   0x4   :  { %v38_v3 = vadd.s32 120, %v361_v1  ;;  %v364_v4 = vand.u32 31, %v40_v2  ;;  %v37_v5 = vadd.s32 112, %v361_v1  ;;  %v36_v6 = vadd.s32 104, %v361_v1 }
   0x5   :  { %v35_v7 = vadd.s32 96, %v361_v1  ;;  %v34_v11 = vadd.s32 88, %v361_v1  ;;  %v33_v14 = vadd.s32 80, %v361_v1  ;;  %v32_v18 = vadd.s32 72, %v361_v1 }
   0x6   :  { %v56_v8 = vand.u32 31, %v38_v3  ;;  %v55_v9 = vand.u32 31, %v37_v5  ;;  %v54_v10 = vand.u32 31, %v36_v6  ;;  %v31_v21 = vadd.s32 64, %v361_v1 }
   0x7   :  { %v53_v13 = vand.u32 31, %v35_v7  ;;  %v52_v17 = vand.u32 31, %v34_v11  ;;  %v51_v20 = vand.u32 31, %v33_v14  ;;  %v50_v24 = vand.u32 31, %v32_v18 }
   0x8   :  { %vm73_vm0 = vcmp.eq.s32.totalorder %v56_v8, %v364_v4  ;;  %vm372_vm1 = vcmp.eq.s32.totalorder %v55_v9, %v364_v4  ;;  %vm71_vm3 = vcmp.eq.s32.totalorder %v54_v10, %v364_v4  ;;  %v30_v25 = vadd.s32 56, %v361_v1 }
   0x9   :  { %285 = vmatpush.msk.msra.mxu0 %vm73_vm0, %v325_v15  ;;  %301 = vmatpush.msk.msra.mxu1 %vm73_vm0, %v325_v15  ;;  %vm390_vm4 = vcmp.eq.s32.totalorder %v53_v13, %v364_v4  ;;  %vm405_vm5 = vcmp.eq.s32.totalorder %v52_v17, %v364_v4  ;;  %vm415_vm6 = vcmp.eq.s32.totalorder %v51_v20, %v364_v4  ;;  %v49_v28 = vand.u32 31, %v31_v21  ;;  %v167_v21 = vld [vmem:[%s539_s2] sm:$0x1] }
   0xa   :  { %v29_v29 = vadd.s32 48, %v361_v1  ;;  %v28_v31 = vadd.s32 40, %v361_v1  ;;  %321 = vrcp.f32 %v171_v30  ;;  %vm67_vm7 = vcmp.eq.s32.totalorder %v50_v24, %v364_v4 }
   0xb   :  { %286 = vmatpush.msk.msra.mxu0 %vm372_vm1, %v325_v15  ;;  %302 = vmatpush.msk.msra.mxu1 %vm372_vm1, %v325_v15  ;;  %v48_v32 = vand.u32 31, %v30_v25  ;;  %vm435_vm8 = vcmp.eq.s32.totalorder %v49_v28, %v364_v4  ;;  %v27_v35 = vadd.s32 32, %v361_v1  ;;  %v109_v36 = vadd.f32 %v108_v26, %v107_v22 }
   0xc   :  { %v47_v34 = vand.u32 31, %v29_v29  ;;  %v46_v37 = vand.u32 31, %v28_v31  ;;  %v26_v38 = vadd.s32 24, %v361_v1  ;;  %v25_v41 = vadd.s32 16, %v361_v1 }
   0xd   :  { %287 = vmatpush.msk.msra.mxu0 %vm71_vm3, %v325_v15  ;;  %303 = vmatpush.msk.msra.mxu1 %vm71_vm3, %v325_v15  ;;  %vm446_vm9 = vcmp.eq.s32.totalorder %v48_v32, %v364_v4  ;;  %v45_v43 = vand.u32 31, %v27_v35  ;;  %v110_v44 = vrot.slane %v109_v36, 2  ;;  %v24_v48 = vadd.s32 8, %v361_v1 }
   0xe   :  { %vm456_vm10 = vcmp.eq.s32.totalorder %v47_v34, %v364_v4  ;;  %vm467_vm11 = vcmp.eq.s32.totalorder %v46_v37, %v364_v4  ;;  %v44_v47 = vand.u32 31, %v26_v38  ;;  %v183_v49 = vand.u32 2147483648, %v171_v30 }
   0xf   :  { %288 = vmatpush.msk.msra.mxu0 %vm390_vm4, %v325_v15  ;;  %304 = vmatpush.msk.msra.mxu1 %vm390_vm4, %v325_v15  ;;  %vm177_vm12 = vweird.f32 %v171_v30  ;;  %v181_v51 = vand.u32 2147483647, %v171_v30  ;;  %vm479_vm14 = vcmp.eq.s32.totalorder %v45_v43, %v364_v4  ;;  %v43_v53 = vand.u32 31, %v25_v41 }
  0x10   :  { %v322_v40 = vpop.eup %321  ;;  %v111_v54 = vadd.f32 %v110_v44, %v109_v36  ;;  %v184_v56 = vor.u32 1.1754944e-38, %v183_v49  ;;  %vm61_vm0 = vcmp.eq.s32.totalorder %v44_v47, %v364_v4  ;;  %v42_v57 = vand.u32 31, %v24_v48 }
  0x11   :  { %289 = vmatpush.msk.msra.mxu0 %vm405_vm5, %v325_v15  ;;  %305 = vmatpush.msk.msra.mxu1 %vm405_vm5, %v325_v15  ;;  %v173_v45 = vmul.f32 %v322_v40, %v171_v30  ;;  %vm178_vm13 = vweird.f32 %v322_v40  ;;  %vm182_vm1 = vcmp.eq.f32.partialorder %v181_v51, 8.507059e+37  ;;  %vm60_vm3 = vcmp.eq.s32.totalorder %v43_v53, %v364_v4 }
  0x12   :  { %vm179_vm15 = vmor %vm177_vm12, %vm178_vm13  ;;  %v41_v59 = vand.u32 31, %v361_v1  ;;  %v112_v60 = vrot.slane %v111_v54, 1  ;;  %vm59_vm4 = vcmp.eq.s32.totalorder %v42_v57, %v364_v4  ;;  %v166_v1 = vld [vmem:[%s537_s1] sm:$0x1]  ;;  %v191_v22 = vstv %s536_s3 }
  0x13   :  { %290 = vmatpush.msk.msra.mxu0 %vm415_vm6, %v325_v15  ;;  %306 = vmatpush.msk.msra.mxu1 %vm415_vm6, %v325_v15  ;;  %v174_v50 = vsub.f32 1.0, %v173_v45  ;;  %v192_v25 = vmul.f32 %v191_v22, %v167_v21 }
  0x14   :  { %vm58_vm5 = vcmp.eq.s32.totalorder %v41_v59, %v364_v4  ;;  %v113_v63 = vadd.f32 %v112_v60, %v111_v54 }
  0x15   :  { %291 = vmatpush.msk.msra.mxu0 %vm67_vm7, %v325_v15  ;;  %307 = vmatpush.msk.msra.mxu1 %vm67_vm7, %v325_v15  ;;  %v175_v55 = vmul.f32 %v322_v40, %v174_v50 }
  0x17   :  { %292 = vmatpush.msk.msra.mxu0 %vm435_vm8, %v325_v15  ;;  %308 = vmatpush.msk.msra.mxu1 %vm435_vm8, %v325_v15  ;;  %v176_v58 = vadd.f32 %v322_v40, %v175_v55 }
  0x19   :  { %293 = vmatpush.msk.msra.mxu0 %vm446_vm9, %v325_v15  ;;  %309 = vmatpush.msk.msra.mxu1 %vm446_vm9, %v325_v15  ;;  %v180_v61 = vsel %vm179_vm15, %v322_v40, %v176_v58 }
  0x1a   :  { %v185_v62 = vsel %vm182_vm1, %v184_v56, %v180_v61 }
  0x1b   :  { %294 = vmatpush.msk.msra.mxu0 %vm456_vm10, %v325_v15  ;;  %310 = vmatpush.msk.msra.mxu1 %vm456_vm10, %v325_v15  ;;  %318 = vpush %v185_v62 }
  0x1d   :  { %295 = vmatpush.msk.msra.mxu0 %vm467_vm11, %v325_v15  ;;  %311 = vmatpush.msk.msra.mxu1 %vm467_vm11, %v325_v15 }
  0x1f   :  { %296 = vmatpush.msk.msra.mxu0 %vm479_vm14, %v325_v15  ;;  %312 = vmatpush.msk.msra.mxu1 %vm479_vm14, %v325_v15 }
  0x21   :  { %297 = vmatpush.msk.msra.mxu0 %vm61_vm0, %v325_v15  ;;  %313 = vmatpush.msk.msra.mxu1 %vm61_vm0, %v325_v15 }
  0x23   :  { %298 = vmatpush.msk.msra.mxu0 %vm60_vm3, %v325_v15  ;;  %314 = vmatpush.msk.msra.mxu1 %vm60_vm3, %v325_v15 }
  0x25   :  { %299 = vmatpush.msk.msra.mxu0 %vm59_vm4, %v325_v15  ;;  %315 = vmatpush.msk.msra.mxu1 %vm59_vm4, %v325_v15 }
  0x27   :  { %300 = vmatpush.msk.msra.mxu0 %vm58_vm5, %v325_v15  ;;  %316 = vmatpush.msk.msra.mxu1 %vm58_vm5, %v325_v15 }
  0x28   :  { %130 = vmatmul.f32.vlgmr.msra.gmra.mxu0 %v113_v63 }
  0x4c   :  { %s319_s25 = spop %318 }
  0x4d   :  { %s187_s29 = smul.f32 8.0, %s319_s25 }
  0x4e   :  { %s213_s8 = smul.f32 %s319_s25, %s196_s28 }
  0x4f   :  { %v188_v3 = vstv %s187_s29 }
  0x50   :  { %v214_v6 = vstv %s213_s8 }
  0xa5   :  { %v131_v0 = vpop.f32.mrf.mxu0 }
  0xa6   :  { %v134_v2 = vmul.f32 0.125, %v131_v0 }
  0xa8   :  { %v135_v4 = vperm.slane %v134_v2, 0  ;;  %v169_v5 = vsub.f32 %v134_v2, %v166_v1 }
  0xaa   :  { %v136_v7 = vsub.f32 %v381_v16, %v135_v4  ;;  %v195_v8 = vmul.f32 %v169_v5, %v169_v5  ;;  %v189_v9 = vmul.f32 %v188_v3, %v169_v5 }
  0xac   :  { %v137_v10 = vmul.f32 %v136_v7, %v136_v7  ;;  %v190_v11 = vadd.f32 %v189_v9, %v166_v1  ;;  %v215_v12 = vmul.f32 %v214_v6, %v195_v8 }
  0xae   :  { %v138_v13 = vsel %vm106_vm2, %v137_v10, 0.0  ;;  %233 = vst [vmem:[%s538_s5] sm:$0x1] %v190_v11  ;;  %v236_v36 = vperm.slane %v190_v11, 0 }
  0xaf   :  { %v139_v14 = vrot.slane %v138_v13, 4 }
  0xb0   :  { %v238_v39 = vsub.f32 %v381_v16, %v236_v36 }
  0xb1   :  { %v140_v15 = vadd.f32 %v139_v14, %v138_v13 }
  0xb3   :  { %v141_v17 = vrot.slane %v140_v15, 2 }
  0xb5   :  { %v142_v18 = vadd.f32 %v141_v17, %v140_v15 }
  0xb7   :  { %v143_v19 = vrot.slane %v142_v18, 1 }
  0xb9   :  { %v144_v20 = vadd.f32 %v143_v19, %v142_v18 }
  0xbb   :  { %161 = vmatmul.f32.vlgmr.msra.gmra.mxu1 %v144_v20 }
 0x138   :  { %v162_v23 = vpop.f32.mrf.mxu1 }
 0x139   :  { %v165_v24 = vmul.f32 0.14285715, %v162_v23 }
 0x13b   :  { %v193_v26 = vmul.f32 8.0, %v165_v24 }
 0x13d   :  { %v194_v27 = vadd.f32 %v193_v26, %v192_v25 }
 0x13f   :  { %v216_v28 = vadd.f32 %v215_v12, %v194_v27 }
 0x141   :  { %v232_v29 = vmul.f32 %v216_v28, %v185_v62 }
 0x143   :  { %234 = vst [vmem:[%s540_s6] sm:$0x1] %v232_v29  ;;  %v239_v30 = vadd.f32 1e-05, %v232_v29 }
 0x145   :  { %323 = vrsqrt.f32 %v239_v30  ;;  %vm246_vm6 = vweird.f32 %v239_v30 }
 0x14b   :  { %v324_v31 = vpop.eup %323 }
 0x14c   :  { %v241_v32 = vmul.f32 %v324_v31, %v239_v30  ;;  %vm247_vm2 = vweird.f32 %v324_v31 }
 0x14d   :  { %vm248_vm7 = vmor %vm246_vm6, %vm247_vm2 }
 0x14e   :  { %v242_v33 = vmul.f32 %v324_v31, %v241_v32 }
 0x150   :  { %v243_v34 = vmul.f32 0.5, %v242_v33 }
 0x152   :  { %v244_v35 = vsub.f32 1.5, %v243_v34 }
 0x154   :  { %v245_v37 = vmul.f32 %v324_v31, %v244_v35 }
 0x156   :  { %v249_v38 = vsel %vm248_vm7, %v324_v31, %v245_v37 }
 0x157   :  { %v251_v40 = vperm.slane %v249_v38, 0 }
 0x159   :  { %v253_v41 = vmul.f32 %v251_v40, %v238_v39 }
 0x15b   :  { %v317_v42 = vclamps-f32 %v253_v41, 5.0 }
 0x15d   :  { %256 = vst [vmem:[%s541_s4] sm:$0x3] %v317_v42 }

</bundles_post_ra>
